<compile_context>
chip_gen: v7x
topology: tpu7x:2x2x1
jax: 0.10.0
libtpu: 0.0.40
codegen_flags: <defaults>
</compile_context>

<pallas_src>
import functools

import jax
import jax.numpy as jnp
from jax.experimental import pallas as pl
from jax.experimental.pallas import tpu as pltpu

NUM_FEATURES = 784
NUM_HIDDEN_1 = 128
NUM_HIDDEN_2 = 256
NUM_CLASSES = 10
NUM_CLASSES_PAD = 128  # lane-dense padded logit width used for compute only


def _round_up(n, m):
    return ((n + m - 1) // m) * m


def _pick_batch_tile(batch, cap):
    """Pick a batch tile: multiple of 16, <= cap, avoiding x padding when possible."""
    cap = max(16, (cap // 16) * 16)
    if batch <= 16:
        return _round_up(batch, 16)
    if batch <= 2 * cap:
        # At least two grid steps so both TensorCores participate on v7x megacore.
        return _round_up(-(-batch // 2), 16)
    # Large batch: largest multiple of 16 <= cap that divides batch (no x padding);
    # fall back to cap (small tail padding) if none exists.
    for cand in range(cap, 15, -16):
        if batch % cand == 0:
            return cand
    return cap


def mlp_kernel(x_ref, w1_ref, b1_ref, w2_ref, b2_ref, w3_ref, b3_ref,
               logits_ref, logprob_ref):
    # Cast the f32 input tile to bf16 in-kernel (f32 MXU accumulation kept).
    x = x_ref[...].astype(jnp.bfloat16)
    # linear_1 + ReLU
    h1 = jnp.dot(x, w1_ref[...], preferred_element_type=jnp.float32)
    h1 = jnp.maximum(h1 + b1_ref[...], 0.0).astype(jnp.bfloat16)
    # linear_2 + ReLU
    h2 = jnp.dot(h1, w2_ref[...], preferred_element_type=jnp.float32)
    h2 = jnp.maximum(h2 + b2_ref[...], 0.0).astype(jnp.bfloat16)
    # linear_out on the 128-lane padded weight (padded cols have zero weight/bias)
    logits = jnp.dot(h2, w3_ref[...], preferred_element_type=jnp.float32) + b3_ref[...]

    # log_softmax over the 10 valid columns only (padded lanes masked out).
    col = jax.lax.broadcasted_iota(jnp.int32, logits.shape, 1)
    valid = col < NUM_CLASSES
    masked = jnp.where(valid, logits, -jnp.inf)
    m = jnp.max(masked, axis=-1, keepdims=True)
    shifted = logits - m
    sum_exp = jnp.sum(jnp.where(valid, jnp.exp(shifted), 0.0),
                      axis=-1, keepdims=True)
    logprob = shifted - jnp.log(sum_exp)

    # Store only the 10 valid columns (narrow writeback, ~12x fewer output bytes).
    logits_ref[...] = logits[:, :NUM_CLASSES].astype(logits_ref.dtype)
    logprob_ref[...] = logprob[:, :NUM_CLASSES].astype(logprob_ref.dtype)


@functools.partial(jax.jit, static_argnames=("batch_tile",))
def mlp_forward(x, w1b, b1, w2b, b2, w3p, b3p, *, batch_tile=1024):
    """Forward pass. Expects params already prepared by prepare_params()."""
    batch = x.shape[0]
    tb = _pick_batch_tile(batch, batch_tile)
    padded_batch = _round_up(batch, tb)
    x = x.astype(jnp.float32)
    if padded_batch != batch:
        x = jnp.pad(x, ((0, padded_batch - batch), (0, 0)))

    grid = (padded_batch // tb,)
    resident = lambda arr: pl.BlockSpec(arr.shape, lambda i: (0, 0))

    weight_bytes = 2 * (NUM_FEATURES * NUM_HIDDEN_1
                        + NUM_HIDDEN_1 * NUM_HIDDEN_2
                        + NUM_HIDDEN_2 * NUM_CLASSES_PAD)
    bias_bytes = 4 * (NUM_HIDDEN_1 + NUM_HIDDEN_2 + NUM_CLASSES_PAD)
    flops = 2 * padded_batch * (NUM_FEATURES * NUM_HIDDEN_1
                                + NUM_HIDDEN_1 * NUM_HIDDEN_2
                                + NUM_HIDDEN_2 * NUM_CLASSES_PAD)
    bytes_accessed = (padded_batch * NUM_FEATURES * 4
                      + weight_bytes + bias_bytes
                      + 2 * padded_batch * NUM_CLASSES * 4)

    # Scoped-VMEM budget: double-buffered f32 x tile dominates; add headroom for
    # intermediates. Clamp to [16 MiB, 48 MiB] (safe on v5e/v6e/v7x).
    vmem_est = (2 * tb * NUM_FEATURES * 4
                + 2 * 2 * tb * NUM_CLASSES * 4
                + 2 * (weight_bytes + bias_bytes)
                + tb * (NUM_HIDDEN_1 * 6 + NUM_HIDDEN_2 * 6 + NUM_CLASSES_PAD * 12)
                + (2 << 20))
    vmem_limit = int(min(max(vmem_est, 16 << 20), 48 << 20))

    logits, log_probas = pl.pallas_call(
        mlp_kernel,
        out_shape=(
            jax.ShapeDtypeStruct((padded_batch, NUM_CLASSES), jnp.float32),
            jax.ShapeDtypeStruct((padded_batch, NUM_CLASSES), jnp.float32),
        ),
        grid=grid,
        in_specs=[
            pl.BlockSpec((tb, NUM_FEATURES), lambda i: (i, 0)),
            resident(w1b), resident(b1),
            resident(w2b), resident(b2),
            resident(w3p), resident(b3p),
        ],
        out_specs=(
            pl.BlockSpec((tb, NUM_CLASSES), lambda i: (i, 0)),
            pl.BlockSpec((tb, NUM_CLASSES), lambda i: (i, 0)),
        ),
        compiler_params=pltpu.CompilerParams(
            dimension_semantics=("parallel",),
            vmem_limit_bytes=vmem_limit),
        cost_estimate=pl.CostEstimate(
            flops=flops,
            transcendentals=padded_batch * (NUM_CLASSES_PAD + 1),
            bytes_accessed=bytes_accessed),
    )(x, w1b, b1, w2b, b2, w3p, b3p)

    if padded_batch != batch:
        logits = logits[:batch]
        log_probas = log_probas[:batch]
    return logits, log_probas


def prepare_params(w1, b1, w2, b2, w3, b3):
    """One-time param prep (hoisted out of the per-call path):
    bf16 weights, f32 biases, final layer zero-padded 10 -> 128 output lanes."""
    pad_c = NUM_CLASSES_PAD - NUM_CLASSES
    return (
        w1.astype(jnp.bfloat16),
        jnp.asarray(b1, jnp.float32).reshape(1, NUM_HIDDEN_1),
        w2.astype(jnp.bfloat16),
        jnp.asarray(b2, jnp.float32).reshape(1, NUM_HIDDEN_2),
        jnp.pad(w3, ((0, 0), (0, pad_c))).astype(jnp.bfloat16),
        jnp.pad(jnp.asarray(b3, jnp.float32).reshape(1, NUM_CLASSES),
                ((0, 0), (0, pad_c))),
    )


def init_params(key):
    k1, k2, k3 = jax.random.split(key, 3)
    # Matches the PyTorch init: weight ~ N(0, 0.1), bias = 0.
    # Stored as (in, out) == transpose of the PyTorch (out, in) layout.
    w1 = jax.random.normal(k1, (NUM_FEATURES, NUM_HIDDEN_1), jnp.float32) * 0.1
    b1 = jnp.zeros((1, NUM_HIDDEN_1), jnp.float32)
    w2 = jax.random.normal(k2, (NUM_HIDDEN_1, NUM_HIDDEN_2), jnp.float32) * 0.1
    b2 = jnp.zeros((1, NUM_HIDDEN_2), jnp.float32)
    w3 = jax.random.normal(k3, (NUM_HIDDEN_2, NUM_CLASSES), jnp.float32) * 0.1
    b3 = jnp.zeros((1, NUM_CLASSES), jnp.float32)
    return w1, b1, w2, b2, w3, b3


if __name__ == "__main__":
    key = jax.random.PRNGKey(0)
    kx, kp = jax.random.split(key)
    batch = 8
    x = jax.random.normal(kx, (batch, NUM_FEATURES), jnp.float32)
    w1, b1, w2, b2, w3, b3 = init_params(kp)
    params = prepare_params(w1, b1, w2, b2, w3, b3)

    logits, log_probas = mlp_forward(x, *params)
    jax.block_until_ready((logits, log_probas))

    # Pure-JAX reference mirroring the kernel's bf16-in / f32-accumulate path.
    xb = x.astype(jnp.bfloat16)
    w1b, w2b, w3b = (w.astype(jnp.bfloat16) for w in (w1, w2, w3))
    h1 = jnp.maximum(jnp.dot(xb, w1b, preferred_element_type=jnp.float32) + b1, 0.0)
    h2 = jnp.maximum(jnp.dot(h1.astype(jnp.bfloat16), w2b,
                             preferred_element_type=jnp.float32) + b2, 0.0)
    ref_logits = jnp.dot(h2.astype(jnp.bfloat16), w3b,
                         preferred_element_type=jnp.float32) + b3
    ref_logprob = jax.nn.log_softmax(ref_logits, axis=1)

    assert logits.shape == (batch, NUM_CLASSES)
    assert log_probas.shape == (batch, NUM_CLASSES)
    assert jnp.allclose(logits, ref_logits, atol=1e-2, rtol=1e-2)
    assert jnp.allclose(log_probas, ref_logprob, atol=1e-2, rtol=1e-2)

    print("KERNEL_OK")
</pallas_src>

<mosaic_0001>
module attributes {stable_mosaic.version = 11 : i64} {
  func.func @mlp_kernel(%arg0: i32, %arg1: memref<16x784xf32, #tpu.memory_space<vmem>>, %arg2: memref<784x128xbf16, #tpu.memory_space<vmem>>, %arg3: memref<1x128xf32, #tpu.memory_space<vmem>>, %arg4: memref<128x256xbf16, #tpu.memory_space<vmem>>, %arg5: memref<1x256xf32, #tpu.memory_space<vmem>>, %arg6: memref<256x128xbf16, #tpu.memory_space<vmem>>, %arg7: memref<1x128xf32, #tpu.memory_space<vmem>>, %arg8: memref<16x10xf32, #tpu.memory_space<vmem>>, %arg9: memref<16x10xf32, #tpu.memory_space<vmem>>) attributes {dimension_semantics = [#tpu.dimension_semantics<parallel>], iteration_bounds = array<i64: 1>, scalar_prefetch = 0 : i64, scratch_operands = 0 : i64, tpu.core_type = #tpu.core_type<tc>, window_params = [{transform_indices = @transform_0, window_bounds = array<i64: 16, 784>}, {pipeline_mode = #tpu.pipeline_mode<synchronous>, transform_indices = @transform_1, window_bounds = array<i64: 784, 128>}, {pipeline_mode = #tpu.pipeline_mode<synchronous>, transform_indices = @transform_2, window_bounds = array<i64: 1, 128>}, {pipeline_mode = #tpu.pipeline_mode<synchronous>, transform_indices = @transform_3, window_bounds = array<i64: 128, 256>}, {pipeline_mode = #tpu.pipeline_mode<synchronous>, transform_indices = @transform_4, window_bounds = array<i64: 1, 256>}, {pipeline_mode = #tpu.pipeline_mode<synchronous>, transform_indices = @transform_5, window_bounds = array<i64: 256, 128>}, {pipeline_mode = #tpu.pipeline_mode<synchronous>, transform_indices = @transform_6, window_bounds = array<i64: 1, 128>}, {transform_indices = @transform_7, window_bounds = array<i64: 16, 10>}, {transform_indices = @transform_8, window_bounds = array<i64: 16, 10>}]} {
    %c0 = arith.constant 0 : index
    %c0_0 = arith.constant 0 : index
    %0 = vector.load %arg1[%c0, %c0_0] : memref<16x784xf32, #tpu.memory_space<vmem>>, vector<16x784xf32>
    %1 = arith.truncf %0 : vector<16x784xf32> to vector<16x784xbf16>
    %c0_1 = arith.constant 0 : index
    %c0_2 = arith.constant 0 : index
    %2 = vector.load %arg2[%c0_1, %c0_2] : memref<784x128xbf16, #tpu.memory_space<vmem>>, vector<784x128xbf16>
    %cst = arith.constant dense<0.000000e+00> : vector<16x128xf32>
    %3 = tpu.matmul %1, %2, %cst {dimension_numbers = #tpu.dot_dimension_numbers<[1], [0], [0], [1], [0, 0, 1, 1], [], []>} : vector<16x784xbf16>, vector<784x128xbf16>, vector<16x128xf32> -> vector<16x128xf32>
    %c0_3 = arith.constant 0 : index
    %c0_4 = arith.constant 0 : index
    %4 = vector.load %arg3[%c0_3, %c0_4] : memref<1x128xf32, #tpu.memory_space<vmem>>, vector<1x128xf32>
    %5 = vector.broadcast %4 : vector<1x128xf32> to vector<16x128xf32>
    %6 = arith.addf %3, %5 : vector<16x128xf32>
    %cst_5 = arith.constant 0.000000e+00 : f32
    %7 = vector.broadcast %cst_5 : f32 to vector<16x128xf32>
    %8 = arith.maximumf %6, %7 : vector<16x128xf32>
    %9 = arith.truncf %8 : vector<16x128xf32> to vector<16x128xbf16>
    %c0_6 = arith.constant 0 : index
    %c0_7 = arith.constant 0 : index
    %10 = vector.load %arg4[%c0_6, %c0_7] : memref<128x256xbf16, #tpu.memory_space<vmem>>, vector<128x256xbf16>
    %cst_8 = arith.constant dense<0.000000e+00> : vector<16x256xf32>
    %11 = tpu.matmul %9, %10, %cst_8 {dimension_numbers = #tpu.dot_dimension_numbers<[1], [0], [0], [1], [0, 0, 1, 1], [], []>} : vector<16x128xbf16>, vector<128x256xbf16>, vector<16x256xf32> -> vector<16x256xf32>
    %c0_9 = arith.constant 0 : index
    %c0_10 = arith.constant 0 : index
    %12 = vector.load %arg5[%c0_9, %c0_10] : memref<1x256xf32, #tpu.memory_space<vmem>>, vector<1x256xf32>
    %13 = vector.broadcast %12 : vector<1x256xf32> to vector<16x256xf32>
    %14 = arith.addf %11, %13 : vector<16x256xf32>
    %cst_11 = arith.constant 0.000000e+00 : f32
    %15 = vector.broadcast %cst_11 : f32 to vector<16x256xf32>
    %16 = arith.maximumf %14, %15 : vector<16x256xf32>
    %17 = arith.truncf %16 : vector<16x256xf32> to vector<16x256xbf16>
    %c0_12 = arith.constant 0 : index
    %c0_13 = arith.constant 0 : index
    %18 = vector.load %arg6[%c0_12, %c0_13] : memref<256x128xbf16, #tpu.memory_space<vmem>>, vector<256x128xbf16>
    %cst_14 = arith.constant dense<0.000000e+00> : vector<16x128xf32>
    %19 = tpu.matmul %17, %18, %cst_14 {dimension_numbers = #tpu.dot_dimension_numbers<[1], [0], [0], [1], [0, 0, 1, 1], [], []>} : vector<16x256xbf16>, vector<256x128xbf16>, vector<16x128xf32> -> vector<16x128xf32>
    %c0_15 = arith.constant 0 : index
    %c0_16 = arith.constant 0 : index
    %20 = vector.load %arg7[%c0_15, %c0_16] : memref<1x128xf32, #tpu.memory_space<vmem>>, vector<1x128xf32>
    %21 = vector.broadcast %20 : vector<1x128xf32> to vector<16x128xf32>
    %22 = arith.addf %19, %21 : vector<16x128xf32>
    %23 = tpu.iota {dimensions = array<i32: 1>} : vector<16x128xi32>
    %c10_i32 = arith.constant 10 : i32
    %24 = vector.broadcast %c10_i32 : i32 to vector<16x128xi32>
    %25 = arith.cmpi slt, %23, %24 : vector<16x128xi32>
    %cst_17 = arith.constant 0xFF800000 : f32
    %26 = vector.broadcast %cst_17 : f32 to vector<16x128xf32>
    %27 = arith.select %25, %22, %26 : vector<16x128xi1>, vector<16x128xf32>
    %cst_18 = arith.constant dense<0xFF800000> : vector<16xf32>
    %28 = vector.multi_reduction <maximumf>, %27, %cst_18 [1] : vector<16x128xf32> to vector<16xf32>
    %29 = vector.shape_cast %28 : vector<16xf32> to vector<16x1xf32>
    %30 = vector.broadcast %29 : vector<16x1xf32> to vector<16x128xf32>
    %31 = arith.subf %22, %30 : vector<16x128xf32>
    %32 = math.exp %31 : vector<16x128xf32>
    %cst_19 = arith.constant 0.000000e+00 : f32
    %33 = vector.broadcast %cst_19 : f32 to vector<16x128xf32>
    %34 = arith.select %25, %32, %33 : vector<16x128xi1>, vector<16x128xf32>
    %cst_20 = arith.constant dense<0.000000e+00> : vector<16xf32>
    %35 = vector.multi_reduction <add>, %34, %cst_20 [1] : vector<16x128xf32> to vector<16xf32>
    %36 = vector.shape_cast %35 : vector<16xf32> to vector<16x1xf32>
    %37 = math.log %36 : vector<16x1xf32>
    %38 = vector.broadcast %37 : vector<16x1xf32> to vector<16x128xf32>
    %39 = arith.subf %31, %38 : vector<16x128xf32>
    %40 = vector.extract_strided_slice %22 {offsets = [0, 0], sizes = [16, 10], strides = [1, 1]} : vector<16x128xf32> to vector<16x10xf32>
    %c0_21 = arith.constant 0 : index
    %c0_22 = arith.constant 0 : index
    %41 = vector.load %arg8[%c0_21, %c0_22] : memref<16x10xf32, #tpu.memory_space<vmem>>, vector<16x10xf32>
    tpu.vector_store %arg8[%c0_21, %c0_22], %40 {strides = array<i32>} : memref<16x10xf32, #tpu.memory_space<vmem>>, vector<16x10xf32>,
    %42 = vector.extract_strided_slice %39 {offsets = [0, 0], sizes = [16, 10], strides = [1, 1]} : vector<16x128xf32> to vector<16x10xf32>
    %c0_23 = arith.constant 0 : index
    %c0_24 = arith.constant 0 : index
    %43 = vector.load %arg9[%c0_23, %c0_24] : memref<16x10xf32, #tpu.memory_space<vmem>>, vector<16x10xf32>
    tpu.vector_store %arg9[%c0_23, %c0_24], %42 {strides = array<i32>} : memref<16x10xf32, #tpu.memory_space<vmem>>, vector<16x10xf32>,
    return
  }
  func.func @transform_0(%arg0: i32) -> (i32, i32) {
    %c0_i32 = arith.constant 0 : i32
    %c0_i32_0 = arith.constant 0 : i32
    return %arg0, %c0_i32 : i32, i32
  }
  func.func @transform_1(%arg0: i32) -> (i32, i32) {
    %c0_i32 = arith.constant 0 : i32
    %c0_i32_0 = arith.constant 0 : i32
    %c0_i32_1 = arith.constant 0 : i32
    return %c0_i32, %c0_i32_0 : i32, i32
  }
  func.func @transform_2(%arg0: i32) -> (i32, i32) {
    %c0_i32 = arith.constant 0 : i32
    %c0_i32_0 = arith.constant 0 : i32
    %c0_i32_1 = arith.constant 0 : i32
    return %c0_i32, %c0_i32_0 : i32, i32
  }
  func.func @transform_3(%arg0: i32) -> (i32, i32) {
    %c0_i32 = arith.constant 0 : i32
    %c0_i32_0 = arith.constant 0 : i32
    %c0_i32_1 = arith.constant 0 : i32
    return %c0_i32, %c0_i32_0 : i32, i32
  }
  func.func @transform_4(%arg0: i32) -> (i32, i32) {
    %c0_i32 = arith.constant 0 : i32
    %c0_i32_0 = arith.constant 0 : i32
    %c0_i32_1 = arith.constant 0 : i32
    return %c0_i32, %c0_i32_0 : i32, i32
  }
  func.func @transform_5(%arg0: i32) -> (i32, i32) {
    %c0_i32 = arith.constant 0 : i32
    %c0_i32_0 = arith.constant 0 : i32
    %c0_i32_1 = arith.constant 0 : i32
    return %c0_i32, %c0_i32_0 : i32, i32
  }
  func.func @transform_6(%arg0: i32) -> (i32, i32) {
    %c0_i32 = arith.constant 0 : i32
    %c0_i32_0 = arith.constant 0 : i32
    %c0_i32_1 = arith.constant 0 : i32
    return %c0_i32, %c0_i32_0 : i32, i32
  }
  func.func @transform_7(%arg0: i32) -> (i32, i32) {
    %c0_i32 = arith.constant 0 : i32
    %c0_i32_0 = arith.constant 0 : i32
    return %arg0, %c0_i32 : i32, i32
  }
  func.func @transform_8(%arg0: i32) -> (i32, i32) {
    %c0_i32 = arith.constant 0 : i32
    %c0_i32_0 = arith.constant 0 : i32
    return %arg0, %c0_i32 : i32, i32
  }
}

</mosaic_0001>

<bundles_post_ra>
// kernel: mlp_forward.1
= control target key start
LH: loop header
LB: loop body
LE: loop exit
PB: predicated region body
PF: predicated region fallthrough
CT: control target
= control target key end

     0   :  { %14 = vsyncpa [#allocation3], 0  ;;  %s1550_s0 = inlined_call_operand.vmem [shape: f32[16,784], index: 0, kind: input, shape index: {}]   ;;  %s1551_s1 = inlined_call_operand.hbm [shape: bf16[784,128], index: 1, kind: input, shape index: {}]   ;;  %s1552_s2 = inlined_call_operand.vmem [shape: f32[1,128], index: 2, kind: input, shape index: {}]   ;;  %s1553_s3 = inlined_call_operand.vmem [shape: bf16[128,256], index: 3, kind: input, shape index: {}]   ;;  %s1554_s4 = inlined_call_operand.vmem [shape: f32[1,256], index: 4, kind: input, shape index: {}]   ;;  %s1555_s5 = inlined_call_operand.hbm [shape: bf16[256,128], index: 5, kind: input, shape index: {}]   ;;  %s1556_s6 = inlined_call_operand.vmem [shape: f32[1,128], index: 6, kind: input, shape index: {}]   ;;  %s1557_s7 = inlined_call_operand.vmem [shape: f32[16,10], index: 7, kind: output, shape index: {0}]   ;;  %s1558_s8 = inlined_call_operand.vmem [shape: f32[16,10], index: 8, kind: output, shape index: {1}]  }
   0x1   :  { %15 = vsyncpa [#allocation5], 0  ;;  %s1355_s27 = smov [#allocation2]   ;;  %s1307_s9 = scalar_lea.hbm %s1551_s1, 6272 }
   0x2   :  { %s23_s28 = sshll.u32 %s1355_s27, 4  ;;  %p1308_p0 = scmp.ne.s32.totalorder %s1551_s1, %s1307_s9  ;;  %s24_s28 = int_to_ptr.vmem [resolvable:$true] %s23_s28 }
   0x3   :  { %p1311_p1 = scmp.lt.u32.totalorder %s1307_s9, %s1551_s1 }
   0x5   :  { %p1313_p2 = pnand %p1311_p1, %p1308_p0 }
   0x7   :  { %1316 = shalt.err (!%p1313_p2)
}
   0x8   :  { %s1317_s14 = scalar_lea.vmem %s24_s28, 6272  ;;  %p1322_p4 = scmp.lt.s32.totalorder %s24_s28, %s24_s28 }
   0x9   :  { %p1318_p3 = scmp.ne.s32.totalorder %s24_s28, %s1317_s14  ;;  %p1323_p5 = scmp.lt.s32.totalorder %s1317_s14, %s1317_s14 }
   0xb   :  { %p1324_p6 = por %p1323_p5, %p1322_p4 }
   0xd   :  { %p1325_p7 = pnand %p1324_p6, %p1318_p3 }
   0xf   :  { %1328 = shalt.err (!%p1325_p7)
}
  0x10   :  { %s1356_s15 = smov 64   ;;  %s1357_s16 = smov 4  }
  0x11   :  { %29 = dma.hbm_to_vmem [thread:$0]  %s1551_s1, 6272, %s24_s28, [#allocation3], %s1356_s15, %s1356_s15, %s1357_s16  }
  0x12   :  { %s1358_s19 = smov [#allocation4]   ;;  %s1329_s23 = scalar_lea.hbm %s1555_s5, 2048 }
  0x13   :  { %s41_s20 = sshll.u32 %s1358_s19, 4  ;;  %p1330_p8 = scmp.ne.s32.totalorder %s1555_s5, %s1329_s23  ;;  %s42_s20 = int_to_ptr.vmem [resolvable:$true] %s41_s20 }
  0x14   :  { %p1333_p9 = scmp.lt.u32.totalorder %s1329_s23, %s1555_s5 }
  0x16   :  { %p1335_p10 = pnand %p1333_p9, %p1330_p8 }
  0x18   :  { %1338 = shalt.err (!%p1335_p10)
}
  0x19   :  { %s1339_s29 = scalar_lea.vmem %s42_s20, 2048  ;;  %p1344_p12 = scmp.lt.s32.totalorder %s42_s20, %s42_s20 }
  0x1a   :  { %p1340_p11 = scmp.ne.s32.totalorder %s42_s20, %s1339_s29  ;;  %p1345_p13 = scmp.lt.s32.totalorder %s1339_s29, %s1339_s29 }
  0x1c   :  { %p1346_p0 = por %p1345_p13, %p1344_p12 }
  0x1e   :  { %p1347_p1 = pnand %p1346_p0, %p1340_p11 }
  0x20   :  { %1350 = shalt.err (!%p1347_p1)
}
  0x21   :  { %47 = dma.hbm_to_vmem [thread:$0]  %s1555_s5, 2048, %s42_s20, [#allocation5], %s1356_s15, %s1356_s15, %s1357_s16  }
  0x22   :  { %1351 = dma.done.wait [#allocation3], 6272  }
  0x23   :  { %1352 = vsyncadd [#allocation3], 4294961024 }
  0x24   :  { %1353 = dma.done.wait [#allocation5], 2048  }
  0x25   :  { %1354 = vsyncadd [#allocation5], 4294965248  ;;  %v1210_v0 = vld [vmem:[#allocation2 + $0x40] sm:$0xff]   ;;  %v1214_v4 = vld [vmem:[#allocation2 + $0x48] sm:$0xff]   ;;  %v1359_v43 = vmov 0.0   ;;  %vm1360_vm0 = vmmov 0  }
  0x26   :  { %v1211_v1 = vld [vmem:[#allocation2] sm:$0xff]   ;;  %1107 = vmatprep.subr.bf16.mxu0 %v1210_v0  ;;  %v1215_v5 = vld [vmem:[#allocation2 + $0x8] sm:$0xff]   ;;  %v1218_v8 = vld [vmem:[#allocation2 + $0x50] sm:$0xff]   ;;  %vm477_vm1 = vcmask 130048   ;;  %vm1008_vm2 = vcmask 80896  }
  0x27   :  { %v1212_v2 = vld [vmem:[#allocation2 + $0xc0] sm:$0xff]   ;;  %1108 = vmatpush3.bf16.msra.mxu0 %v1211_v1  ;;  %v1216_v6 = vld [vmem:[#allocation2 + $0xc8] sm:$0xff]   ;;  %v1219_v9 = vld [vmem:[#allocation2 + $0x10] sm:$0xff]  }
  0x28   :  { %v1213_v3 = vld [vmem:[#allocation2 + $0x80] sm:$0xff]   ;;  %1129 = vmatprep.subr.bf16.mxu1 %v1212_v2  ;;  %1109 = vmatprep.subr.bf16.mxu0 %v1214_v4  ;;  %v1217_v7 = vld [vmem:[#allocation2 + $0x88] sm:$0xff]   ;;  %v1220_v10 = vld [vmem:[#allocation2 + $0xd0] sm:$0xff]  }
  0x29   :  { %1130 = vmatpush3.bf16.msra.mxu1 %v1213_v3  ;;  %v1221_v11 = vld [vmem:[#allocation2 + $0x90] sm:$0xff]   ;;  %v1222_v12 = vld [vmem:[#allocation2 + $0x58] sm:$0xff]   ;;  %v1226_v16 = vld [vmem:[#allocation2 + $0x60] sm:$0xff]  }
  0x2a   :  { %1131 = vmatprep.subr.bf16.mxu1 %v1216_v6  ;;  %v1223_v13 = vld [vmem:[#allocation2 + $0x18] sm:$0xff]   ;;  %v1227_v17 = vld [vmem:[#allocation2 + $0x20] sm:$0xff]   ;;  %v1230_v20 = vld [vmem:[#allocation2 + $0x68] sm:$0xff]  }
  0x2b   :  { %1110 = vmatpush3.bf16.msra.mxu0 %v1215_v5  ;;  %v1224_v14 = vld [vmem:[#allocation2 + $0xd8] sm:$0xff]   ;;  %v1228_v18 = vld [vmem:[#allocation2 + $0xe0] sm:$0xff]   ;;  %v1231_v21 = vld [vmem:[#allocation2 + $0x28] sm:$0xff]  }
  0x2c   :  { %1111 = vmatprep.subr.bf16.mxu0 %v1218_v8  ;;  %v1225_v15 = vld [vmem:[#allocation2 + $0x98] sm:$0xff]   ;;  %v1229_v19 = vld [vmem:[#allocation2 + $0xa0] sm:$0xff]   ;;  %v1232_v22 = vld [vmem:[#allocation2 + $0xe8] sm:$0xff]  }
  0x2d   :  { %1132 = vmatpush3.bf16.msra.mxu1 %v1217_v7  ;;  %v1233_v23 = vld [vmem:[#allocation2 + $0xa8] sm:$0xff]   ;;  %v1234_v24 = vld [vmem:[#allocation2 + $0x70] sm:$0xff]   ;;  %v1238_v28 = vld [vmem:[#allocation2 + $0x78] sm:$0xff]  }
  0x2e   :  { %1133 = vmatprep.subr.bf16.mxu1 %v1220_v10  ;;  %v1235_v25 = vld [vmem:[#allocation2 + $0x30] sm:$0xff]   ;;  %v1239_v29 = vld [vmem:[#allocation2 + $0x38] sm:$0xff]   ;;  %v58_v31 = vld [vmem:[%s1550_s0 + $0x8] sm:$0xff] }
  0x2f   :  { %1112 = vmatpush3.bf16.msra.mxu0 %v1219_v9  ;;  %v1236_v26 = vld [vmem:[#allocation2 + $0xf0] sm:$0xff]   ;;  %v1240_v30 = vld [vmem:[#allocation2 + $0xf8] sm:$0xff]   ;;  %v65_v32 = vld [vmem:[%s1550_s0 + $0x40] sm:$0xff] }
  0x30   :  { %1113 = vmatprep.subr.bf16.mxu0 %v1222_v12  ;;  %v1237_v27 = vld [vmem:[#allocation2 + $0xb0] sm:$0xff]   ;;  %v72_v33 = vpack.c.bf16 %v65_v32, %v58_v31  ;;  %v1241_v34 = vld [vmem:[#allocation2 + $0xb8] sm:$0xff]   ;;  %v57_v35 = vld [vmem:[%s1550_s0] sm:$0xff] }
  0x31   :  { %1134 = vmatpush3.bf16.msra.mxu1 %v1221_v11  ;;  %v64_v36 = vld [vmem:[%s1550_s0 + $0x38] sm:$0xff]  ;;  %v1242_v38 = vld [vmem:[#allocation2 + $0x140] sm:$0xff]   ;;  %v67_v40 = vld [vmem:[%s1550_s0 + $0x50] sm:$0xff] }
  0x32   :  { %1135 = vmatprep.subr.bf16.mxu1 %v1224_v14  ;;  %513 = vmatprep.mubr.bf16.mxu0 %v72_v33  ;;  %v71_v37 = vpack.c.bf16 %v64_v36, %v57_v35  ;;  %v60_v39 = vld [vmem:[%s1550_s0 + $0x18] sm:$0xff]  ;;  %v1243_v42 = vld [vmem:[#allocation2 + $0x100] sm:$0xff]   ;;  %v59_v44 = vld [vmem:[%s1550_s0 + $0x10] sm:$0xff] }
  0x33   :  { %1114 = vmatpush3.bf16.msra.mxu0 %v1223_v13  ;;  %v74_v41 = vpack.c.bf16 %v67_v40, %v60_v39  ;;  %v66_v45 = vld [vmem:[%s1550_s0 + $0x48] sm:$0xff]  ;;  %v1246_v49 = vld [vmem:[#allocation2 + $0x150] sm:$0xff]   ;;  %v1248_v51 = vld [vmem:[#allocation2 + $0x158] sm:$0xff]  }
  0x34   :  { %1115 = vmatprep.subr.bf16.mxu0 %v1226_v16  ;;  %v73_v46 = vpack.c.bf16 %v66_v45, %v59_v44  ;;  %v1244_v47 = vld [vmem:[#allocation2 + $0x148] sm:$0xff]   ;;  %v1247_v50 = vld [vmem:[#allocation2 + $0x110] sm:$0xff]   ;;  %v1249_v52 = vld [vmem:[#allocation2 + $0x118] sm:$0xff]  }
  0x35   :  { %1136 = vmatpush3.bf16.msra.mxu1 %v1225_v15  ;;  %554 = vmatprep.mubr.bf16.mxu1 %v74_v41  ;;  %v1245_v48 = vld [vmem:[#allocation2 + $0x108] sm:$0xff]   ;;  %v1250_v53 = vld [vmem:[#allocation2 + $0x160] sm:$0xff]   ;;  %v1254_v59 = vld [vmem:[#allocation2 + $0x170] sm:$0xff]  }
  0x36   :  { %1137 = vmatprep.subr.bf16.mxu1 %v1228_v18  ;;  %v1251_v54 = vld [vmem:[#allocation2 + $0x120] sm:$0xff]   ;;  %v1252_v55 = vld [vmem:[#allocation2 + $0x168] sm:$0xff]   ;;  %v63_v62 = vld [vmem:[%s1550_s0 + $0x30] sm:$0xff] }
  0x37   :  { %1116 = vmatpush3.bf16.msra.mxu0 %v1227_v17  ;;  %v1258_v56 = vld [vmem:[#allocation2 + $0x180] sm:$0xff]   ;;  %v62_v57 = vld [vmem:[%s1550_s0 + $0x28] sm:$0xff]  ;;  %v1255_v1 = vld [vmem:[#allocation2 + $0x130] sm:$0xff]  }
  0x38   :  { %1117 = vmatprep.subr.bf16.mxu0 %v1230_v20  ;;  %v1253_v58 = vld [vmem:[#allocation2 + $0x128] sm:$0xff]   ;;  %v69_v60 = vld [vmem:[%s1550_s0 + $0x60] sm:$0xff]  ;;  %v1256_v2 = vld [vmem:[#allocation2 + $0x178] sm:$0xff]  }
  0x39   :  { %1138 = vmatpush3.bf16.msra.mxu1 %v1229_v19  ;;  %v76_v61 = vpack.c.bf16 %v69_v60, %v62_v57  ;;  %v70_v63 = vld [vmem:[%s1550_s0 + $0x68] sm:$0xff]  ;;  %v1257_v3 = vld [vmem:[#allocation2 + $0x138] sm:$0xff]   ;;  %v61_v4 = vld [vmem:[%s1550_s0 + $0x20] sm:$0xff] }
  0x3a   :  { %1139 = vmatprep.subr.bf16.mxu1 %v1232_v22  ;;  %v77_v0 = vpack.c.bf16 %v70_v63, %v63_v62  ;;  %v68_v5 = vld [vmem:[%s1550_s0 + $0x58] sm:$0xff]  ;;  %v1259_v7 = vld [vmem:[%s1553_s3] ss:$8 sps:$4 sm:$0xff]   ;;  %v1261_v8 = vld [vmem:[%s1553_s3 + $0x4] ss:$8 sps:$4 sm:$0xff]  }
  0x3b   :  { %1118 = vmatpush3.bf16.msra.mxu0 %v1231_v21  ;;  %v75_v6 = vpack.c.bf16 %v68_v5, %v61_v4  ;;  %v1264_v9 = vld [vmem:[%s1553_s3 + $0x14] ss:$8 sps:$4 sm:$0xff]   ;;  %v1262_v10 = vld [vmem:[%s1553_s3 + $0x10] ss:$8 sps:$4 sm:$0xff]   ;;  %v1267_v11 = vld [vmem:[%s1553_s3 + $0x24] ss:$8 sps:$4 sm:$0xff]  }
  0x3c   :  { %1119 = vmatprep.subr.bf16.mxu0 %v1234_v24  ;;  %v1265_v12 = vld [vmem:[%s1553_s3 + $0x20] ss:$8 sps:$4 sm:$0xff]   ;;  %v1270_v13 = vld [vmem:[%s1553_s3 + $0x34] ss:$8 sps:$4 sm:$0xff]   ;;  %v1268_v14 = vld [vmem:[%s1553_s3 + $0x30] ss:$8 sps:$4 sm:$0xff]  }
  0x3d   :  { %1140 = vmatpush3.bf16.msra.mxu1 %v1233_v23  ;;  %v1273_v15 = vld [vmem:[%s1553_s3 + $0x44] ss:$8 sps:$4 sm:$0xff]   ;;  %v1271_v16 = vld [vmem:[%s1553_s3 + $0x40] ss:$8 sps:$4 sm:$0xff]   ;;  %v1276_v17 = vld [vmem:[%s1553_s3 + $0x54] ss:$8 sps:$4 sm:$0xff]  }
  0x3e   :  { %1141 = vmatprep.subr.bf16.mxu1 %v1236_v26  ;;  %v1274_v18 = vld [vmem:[%s1553_s3 + $0x50] ss:$8 sps:$4 sm:$0xff]   ;;  %v1279_v19 = vld [vmem:[%s1553_s3 + $0x64] ss:$8 sps:$4 sm:$0xff]   ;;  %v1277_v20 = vld [vmem:[%s1553_s3 + $0x60] ss:$8 sps:$4 sm:$0xff]  }
  0x3f   :  { %1120 = vmatpush3.bf16.msra.mxu0 %v1235_v25  ;;  %v1282_v21 = vld [vmem:[%s1553_s3 + $0x74] ss:$8 sps:$4 sm:$0xff]   ;;  %v1280_v22 = vld [vmem:[%s1553_s3 + $0x70] ss:$8 sps:$4 sm:$0xff]   ;;  %v1361_v23 = vmov 0   ;;  %v1283_v24 = vld [vmem:[#allocation4 + $0x40] sm:$0xff]  }
  0x40   :  { %1121 = vmatprep.subr.bf16.mxu0 %v1238_v28  ;;  %v1284_v25 = vld [vmem:[#allocation4] sm:$0xff]   ;;  %v1285_v26 = vld [vmem:[#allocation4 + $0x48] sm:$0xff]   ;;  %v1287_v28 = vld [vmem:[#allocation4 + $0x50] sm:$0xff]  }
  0x41   :  { %1142 = vmatpush3.bf16.msra.mxu1 %v1237_v27  ;;  %v1286_v27 = vld [vmem:[#allocation4 + $0x8] sm:$0xff]   ;;  %v1290_v31 = vld [vmem:[#allocation4 + $0x18] sm:$0xff]   ;;  %v1291_v32 = vld [vmem:[#allocation4 + $0x60] sm:$0xff]  }
  0x42   :  { %1143 = vmatprep.subr.bf16.mxu1 %v1240_v30  ;;  %v1289_v30 = vld [vmem:[#allocation4 + $0x58] sm:$0xff]   ;;  %v1292_v33 = vld [vmem:[#allocation4 + $0x20] sm:$0xff]   ;;  %v1294_v5 = vld [vmem:[#allocation4 + $0x28] sm:$0xff]  }
  0x43   :  { %1122 = vmatpush3.bf16.msra.mxu0 %v1239_v29  ;;  %v1288_v29 = vld [vmem:[#allocation4 + $0x10] sm:$0xff]   ;;  %v1023_v36 = vld [vmem:[%s1552_s2] ss:$0 sm:$0xff] }
  0x44   :  { %1151 = vmatprep.subr.bf16.mxu0 %v1242_v38 }
  0x45   :  { %1144 = vmatpush3.bf16.msra.mxu1 %v1241_v34  ;;  %v1293_v34 = vld [vmem:[#allocation4 + $0x68] sm:$0xff]  }
  0x46   :  { %1197 = vmatprep.subr.bf16.mxu1 %v1359_v43  ;;  %514 = vmatmul.mubr.bf16.vlgmr.msra.gmra.mrb[0].mxu0 %v71_v37 }
  0x47   :  { %1152 = vmatpush3.bf16.msra.mxu0 %v1243_v42  ;;  %595 = vmatprep.mubr.bf16.mxu0 %v76_v61 }
  0x48   :  { %555 = vmatmul.mubr.bf16.vlgmr.msra.gmra.mrb[0].mxu1 %v73_v46  ;;  %1153 = vmatprep.subr.bf16.mxu0 %v1244_v47 }
  0x49   :  { %1199 = vmatprep.mubr.msk.bf16.mxu1 %vm1360_vm0, %v1359_v43  ;;  %1198 = vmatpush3.bf16.msra.mxu1 %v1258_v56 }
  0x4a   :  { %756 = vmatprep.subr.bf16.mxu1 %v1261_v8  ;;  %v1297_v8 = vld [vmem:[#allocation4 + $0x78] sm:$0xff]  }
  0x4b   :  { %1154 = vmatpush3.bf16.msra.mxu0 %v1245_v48 }
  0x4c   :  { %1155 = vmatprep.subr.bf16.mxu0 %v1246_v49 }
  0x4f   :  { %1156 = vmatpush3.bf16.msra.mxu0 %v1247_v50 }
  0x50   :  { %1157 = vmatprep.subr.bf16.mxu0 %v1248_v51  ;;  %1200 = vmatmul.mubr.msk.bf16.vlgmr.msra.gmra.mrb[4].mxu1 %vm477_vm1, %v77_v0 }
  0x51   :  { %757 = vmatpush1.bf16.msra.mxu1 %v1259_v7  ;;  %788 = vmatprep.mubr.bf16.mxu1 %v1361_v23  ;;  %v1296_v7 = vld [vmem:[#allocation4 + $0x30] sm:$0xff]  }
  0x52   :  { %758 = vmatprep.subr.bf16.mxu1 %v1264_v9  ;;  %v1298_v9 = vld [vmem:[#allocation4 + $0x38] sm:$0xff]  }
  0x53   :  { %1158 = vmatpush3.bf16.msra.mxu0 %v1249_v52 }
  0x54   :  { %1159 = vmatprep.subr.bf16.mxu0 %v1250_v53 }
  0x55   :  { %759 = vmatpush1.bf16.msra.mxu1 %v1262_v10  ;;  %v666_v10 = vlaneseq }
  0x56   :  { %760 = vmatprep.subr.bf16.mxu1 %v1267_v11 }
  0x57   :  { %1160 = vmatpush3.bf16.msra.mxu0 %v1251_v54  ;;  %v667_v11 = vshrl.u32 %v666_v10, 7 }
  0x58   :  { %1161 = vmatprep.subr.bf16.mxu0 %v1252_v55 }
  0x59   :  { %761 = vmatpush1.bf16.msra.mxu1 %v1265_v12  ;;  %v668_v12 = vsub.s32 0, %v667_v11 }
  0x5a   :  { %762 = vmatprep.subr.bf16.mxu1 %v1270_v13  ;;  %v664_v13 = vld [vmem:[%s1554_s4] sm:$0x3] }
  0x5b   :  { %1162 = vmatpush3.bf16.msra.mxu0 %v1253_v58 }
  0x5c   :  { %1163 = vmatprep.subr.bf16.mxu0 %v1254_v59 }
  0x5d   :  { %763 = vmatpush1.bf16.msra.mxu1 %v1268_v14  ;;  %v672_v14 = vsub.s32 1, %v667_v11 }
  0x5e   :  { %764 = vmatprep.subr.bf16.mxu1 %v1273_v15  ;;  %v669_v15 = vrot.slane %v664_v13, %v668_v12 }
  0x5f   :  { %1164 = vmatpush3.bf16.msra.mxu0 %v1255_v1 }
  0x60   :  { %1165 = vmatprep.subr.bf16.mxu0 %v1256_v2 }
  0x61   :  { %765 = vmatpush1.bf16.msra.mxu1 %v1271_v16  ;;  %v673_v16 = vrot.slane %v664_v13, %v672_v14 }
  0x62   :  { %766 = vmatprep.subr.bf16.mxu1 %v1276_v17 }
  0x63   :  { %1166 = vmatpush3.bf16.msra.mxu0 %v1257_v3 }
  0x64   :  { %1175 = vmatprep.subr.bf16.mxu0 %v1283_v24 }
  0x65   :  { %767 = vmatpush1.bf16.msra.mxu1 %v1274_v18 }
  0x66   :  { %596 = vmatmul.mubr.bf16.vlgmr.msra.gmra.mrb[4].mxu0 %v75_v6  ;;  %768 = vmatprep.subr.bf16.mxu1 %v1279_v19  ;;  %v1295_v6 = vld [vmem:[#allocation4 + $0x70] sm:$0xff]  }
  0x67   :  { %1176 = vmatpush3.bf16.msra.mxu0 %v1284_v25 }
  0x68   :  { %1177 = vmatprep.subr.bf16.mxu0 %v1285_v26 }
  0x69   :  { %769 = vmatpush1.bf16.msra.mxu1 %v1277_v20 }
  0x6a   :  { %770 = vmatprep.subr.bf16.mxu1 %v1282_v21 }
  0x6b   :  { %1178 = vmatpush3.bf16.msra.mxu0 %v1286_v27 }
  0x6c   :  { %1179 = vmatprep.subr.bf16.mxu0 %v1287_v28 }
  0x6d   :  { %771 = vmatpush1.bf16.msra.mxu1 %v1280_v22 }
  0x6f   :  { %1180 = vmatpush3.bf16.msra.mxu0 %v1288_v29 }
  0x70   :  { %1181 = vmatprep.subr.bf16.mxu0 %v1289_v30 }
  0x73   :  { %1182 = vmatpush3.bf16.msra.mxu0 %v1290_v31  ;;  %v982_v31 = vand.u32 127, %v666_v10 }
  0x74   :  { %1183 = vmatprep.subr.bf16.mxu0 %v1291_v32 }
  0x75   :  { %vm983_vm3 = vcmp.lt.s32.totalorder %v982_v31, 10 }
  0x77   :  { %1184 = vmatpush3.bf16.msra.mxu0 %v1292_v33  ;;  %v1090_v33 = vld [vmem:[%s1556_s6] ss:$0 sm:$0xff] }
  0x78   :  { %1185 = vmatprep.subr.bf16.mxu0 %v1293_v34 }
  0x7b   :  { %1186 = vmatpush3.bf16.msra.mxu0 %v1294_v5 }
  0x7c   :  { %1187 = vmatprep.subr.bf16.mxu0 %v1295_v6 }
  0x7f   :  { %1188 = vmatpush3.bf16.msra.mxu0 %v1296_v7 }
  0x80   :  { %1189 = vmatprep.subr.bf16.mxu0 %v1297_v8 }
  0x83   :  { %1190 = vmatpush3.bf16.msra.mxu0 %v1298_v9 }
 0x119   :  { %v1123_v35 = vpop.f32.mrb[0].mxu0 }
 0x11a   :  { %v1124_v37 = vpop.f32.mrb[1].mxu0 }
 0x11b   :  { %v1125_v38 = vadd.f32 %v1124_v37, %v1123_v35  ;;  %v1126_v39 = vpop.f32.mrb[2].mxu0  ;;  %v1145_v40 = vpop.f32.mrb[0].mxu1 }
 0x11c   :  { %v1127_v41 = vpop.f32.mrb[3].mxu0  ;;  %v1146_v44 = vpop.f32.mrb[1].mxu1 }
 0x11d   :  { %v516_v42 = vadd.f32 %v1125_v38, %v1023_v36  ;;  %v1128_v43 = vadd.f32 %v1127_v41, %v1126_v39  ;;  %v1147_v45 = vadd.f32 %v1146_v44, %v1145_v40  ;;  %v1148_v46 = vpop.f32.mrb[2].mxu1 }
 0x11e   :  { %v1149_v48 = vpop.f32.mrb[3].mxu1 }
 0x11f   :  { %v519_v47 = vadd.f32 %v1128_v43, %v1023_v36  ;;  %v557_v49 = vadd.f32 %v1147_v45, %v516_v42  ;;  %v1150_v50 = vadd.f32 %v1149_v48, %v1148_v46 }
 0x121   :  { %v560_v51 = vadd.f32 %v1150_v50, %v519_v47 }
 0x123   :  { %v638_v52 = vpop.f32.mrb[4].mxu1 }
 0x124   :  { %v1201_v53 = vpop.f32.mrb[5].mxu1 }
 0x125   :  { %v641_v54 = vpop.f32.mrb[6].mxu1 }
 0x126   :  { %v1202_v55 = vpop.f32.mrb[7].mxu1 }
 0x139   :  { %v1167_v56 = vpop.f32.mrb[4].mxu0 }
 0x13a   :  { %v1168_v57 = vpop.f32.mrb[5].mxu0 }
 0x13b   :  { %v1169_v58 = vadd.f32 %v1168_v57, %v1167_v56  ;;  %v1170_v59 = vpop.f32.mrb[6].mxu0 }
 0x13c   :  { %v1171_v60 = vpop.f32.mrb[7].mxu0 }
 0x13d   :  { %v598_v61 = vadd.f32 %v1169_v58, %v557_v49  ;;  %v1172_v62 = vadd.f32 %v1171_v60, %v1170_v59 }
 0x13f   :  { %v639_v63 = vadd.f32 %v638_v52, %v598_v61  ;;  %v601_v0 = vadd.f32 %v1172_v62, %v560_v51 }
 0x141   :  { %v642_v1 = vadd.f32 %v641_v54, %v601_v0  ;;  %v645_v2 = vmax.f32 %v639_v63, 0.0 }
 0x143   :  { %v646_v3 = vmax.f32 %v642_v1, 0.0 }
 0x145   :  { %v647_v4 = vpack.c.bf16 %v646_v3, %v645_v2 }
 0x147   :  { %789 = vmatmul.mubr.bf16.vlgmr.msra.gmra.mrb[8].mxu1 %v647_v4 }
 0x21a   :  { %v790_v17 = vpop.f32.mrb[8].mxu1 }
 0x21b   :  { %v791_v18 = vadd.f32 %v790_v17, %v669_v15  ;;  %v792_v19 = vpop.f32.mrb[9].mxu1 }
 0x21c   :  { %v793_v20 = vadd.f32 %v792_v19, %v673_v16  ;;  %v794_v21 = vpop.f32.mrb[10].mxu1 }
 0x21d   :  { %v795_v22 = vadd.f32 %v794_v21, %v669_v15  ;;  %v796_v23 = vpop.f32.mrb[11].mxu1  ;;  %v799_v25 = vmax.f32 %v791_v18, 0.0 }
 0x21e   :  { %v797_v24 = vadd.f32 %v796_v23, %v673_v16  ;;  %v800_v27 = vmax.f32 %v793_v20, 0.0 }
 0x21f   :  { %v801_v26 = vmax.f32 %v795_v22, 0.0 }
 0x220   :  { %v802_v28 = vmax.f32 %v797_v24, 0.0 }
 0x221   :  { %v803_v29 = vpack.c.bf16 %v801_v26, %v799_v25 }
 0x222   :  { %v804_v30 = vpack.c.bf16 %v802_v28, %v800_v27 }
 0x224   :  { %972 = vmatprep.mubr.bf16.mxu0 %v804_v30 }
 0x225   :  { %973 = vmatmul.mubr.bf16.vlgmr.msra.gmra.mrb[8].mxu0 %v803_v29 }
 0x2f8   :  { %v1191_v32 = vpop.f32.mrb[8].mxu0 }
 0x2f9   :  { %v1192_v34 = vpop.f32.mrb[9].mxu0 }
 0x2fa   :  { %v1193_v35 = vadd.f32 %v1192_v34, %v1191_v32  ;;  %v1194_v36 = vpop.f32.mrb[10].mxu0 }
 0x2fb   :  { %v1195_v37 = vpop.f32.mrb[11].mxu0 }
 0x2fc   :  { %v975_v38 = vadd.f32 %v1193_v35, %v1090_v33  ;;  %v1196_v39 = vadd.f32 %v1195_v37, %v1194_v36 }
 0x2fe   :  { %1009 = vst.msk [vmem:[%s1557_s7] sm:$0xff] %vm1008_vm2, %v975_v38  ;;  %v978_v40 = vadd.f32 %v1196_v39, %v1090_v33  ;;  %v984_v41 = vsel %vm983_vm3, %v975_v38, -inf }
 0x2ff   :  { %986 = vmax.xlane.f32.xlu0 %v984_v41 }
 0x300   :  { %1010 = vst.msk [vmem:[%s1557_s7 + $0x8] sm:$0xff] %vm1008_vm2, %v978_v40  ;;  %v985_v42 = vsel %vm983_vm3, %v978_v40, -inf }
 0x303   :  { %988 = vmax.xlane.f32.xlu0 %v985_v42 }
 0x38c   :  { %v987_v43 = vpop.xlane.xlu0 %986 }
 0x38d   :  { %v990_v44 = vsub.f32 %v975_v38, %v987_v43 }
 0x38f   :  { %v992_v45 = vmul.f32 1.442695, %v990_v44 }
 0x390   :  { %v989_v46 = vpop.xlane.xlu0 %988 }
 0x391   :  { %1299 = vpow2.f32 %v992_v45  ;;  %v991_v47 = vsub.f32 %v978_v40, %v989_v46 }
 0x393   :  { %v994_v48 = vmul.f32 1.442695, %v991_v47 }
 0x395   :  { %1301 = vpow2.f32 %v994_v48 }
 0x39b   :  { %v1300_v49 = vpop.eup %1299 }
 0x39c   :  { %v996_v50 = vsel %vm983_vm3, %v1300_v49, 0.0 }
 0x39d   :  { %998 = vadd.xlane.f32.xlu1 %v996_v50 }
 0x39f   :  { %v1302_v51 = vpop.eup %1301 }
 0x3a0   :  { %v997_v52 = vsel %vm983_vm3, %v1302_v51, 0.0 }
 0x3a1   :  { %1000 = vadd.xlane.f32.xlu1 %v997_v52 }
 0x42a   :  { %v999_v53 = vpop.xlane.xlu1 %998 }
 0x42b   :  { %1303 = vlog2.f32 %v999_v53 }
 0x42e   :  { %v1001_v54 = vpop.xlane.xlu1 %1000 }
 0x42f   :  { %1305 = vlog2.f32 %v1001_v54 }
 0x435   :  { %v1304_v55 = vpop.eup %1303 }
 0x436   :  { %v1003_v56 = vmul.f32 0.6931472, %v1304_v55 }
 0x438   :  { %v1006_v57 = vsub.f32 %v990_v44, %v1003_v56 }
 0x439   :  { %v1306_v58 = vpop.eup %1305 }
 0x43a   :  { %1011 = vst.msk [vmem:[%s1558_s8] sm:$0xff] %vm1008_vm2, %v1006_v57  ;;  %v1005_v59 = vmul.f32 0.6931472, %v1306_v58 }
 0x43c   :  { %v1007_v60 = vsub.f32 %v991_v47, %v1005_v59 }
 0x43e   :  { %1012 = vst.msk [vmem:[%s1558_s8 + $0x8] sm:$0xff] %vm1008_vm2, %v1007_v60 }
 0x43f   :  { %1021 = vsyncpa [#allocation3], 1 }
 0x440   :  { %1022 = vsyncpa [#allocation5], 1 }

</bundles_post_ra>
